<compile_context>
chip_gen: v7x
topology: tpu7x:2x2x1
jax: 0.10.0
libtpu: 0.0.40
codegen_flags: <defaults>
</compile_context>

<pallas_src>
import functools

import jax
import jax.numpy as jnp
from jax.experimental import pallas as pl
from jax.experimental.pallas import tpu as pltpu


def fbcnet_fused_kernel(x_ref, w_ref, b_ref, seg_ref, whead_ref, bsel_ref,
                        blin_ref, o_ref, *, Ts, nClass):
    """Grouped conv (+folded BN) + swish + segment log-var + linear head + logsoftmax."""
    x = x_ref[0]                                                     # (G, Bb*T)
    y = jnp.dot(w_ref[...], x, preferred_element_type=jnp.float32)   # (C, Bb*T)
    y = y + b_ref[...]                                               # conv bias + BN (folded)
    y = y * jax.nn.sigmoid(y)                                        # swish (EUP path)

    # Per-segment sums / sum-of-squares as MXU matmuls against a 0/1 selector,
    # then one vectorized variance/log over the whole (C, Bb*S) tile.
    seg = seg_ref[...]                                               # (Bb*T, Bb*S)
    sums = jnp.dot(y, seg, preferred_element_type=jnp.float32)       # (C, Bb*S)
    ssq = jnp.dot(y * y, seg, preferred_element_type=jnp.float32)    # (C, Bb*S)
    mu = sums * (1.0 / Ts)
    var = (ssq - mu * sums) * (1.0 / (Ts - 1))                       # unbiased (torch.var)
    feat = jnp.log(jnp.clip(var, 1e-6, 1e6))                         # (C, Bb*S)

    # Fused head: logits[k, b] = sum_{c,s} feat[c, b*S+s] * W[k, c, s].
    rows = []
    for k in range(nClass):                                          # tiny static loop
        rows.append(jnp.sum(feat * whead_ref[k], axis=0, keepdims=True))  # (1, Bb*S)
    v = jnp.concatenate(rows, axis=0)                                # (nClass, Bb*S)
    logits_t = jnp.dot(v, bsel_ref[...], preferred_element_type=jnp.float32)  # (nClass, Bb)
    logits_t = logits_t + blin_ref[...]                              # bias

    # LogSoftmax over classes (axis 0 of the transposed logits).
    mx = jnp.max(logits_t, axis=0, keepdims=True)
    lse = jnp.log(jnp.sum(jnp.exp(logits_t - mx), axis=0, keepdims=True)) + mx
    o_ref[0] = logits_t - lse                                        # (nClass, Bb)


def renorm_rows(w, maxnorm):
    """torch.renorm(p=2, dim=0, maxnorm): clip L2 norm of each leading-dim slice."""
    flat = w.reshape(w.shape[0], -1)
    n = jnp.sqrt(jnp.sum(flat * flat, axis=1, keepdims=True))
    scale = jnp.where(n > maxnorm, maxnorm / (n + 1e-7), 1.0)
    return (flat * scale).reshape(w.shape)


def _pick_batch_block(B, T, target_lanes=256):
    """Largest divisor of B with B_blk*T <= target_lanes (fills MXU lanes)."""
    want = max(1, target_lanes // T)
    best = 1
    for cand in range(1, min(B, want) + 1):
        if B % cand == 0:
            best = cand
    return best


def fbcnet_forward(x, params, *, nChan, nBands, m, strideFactor, nClass):
    B, _, T, _ = x.shape
    C = m * nBands
    S = strideFactor
    Ts = T // S
    G = nBands * nChan

    Bb = _pick_batch_block(B, T)
    nb = B // Bb

    # Conv2dWithConstraint: renorm weight (max_norm=2); realize grouped (nChan,1)
    # conv as a block-diagonal matmul.
    w_conv = renorm_rows(params["w_conv"], 2.0)                      # (C, 1, nChan, 1)
    w_sq = w_conv.reshape(C, nChan)
    group = jnp.arange(C) // m                                       # out-channel -> band
    onehot = jax.nn.one_hot(group, nBands, dtype=w_sq.dtype)         # (C, nBands)
    w_bd = (onehot[:, :, None] * w_sq[:, None, :]).reshape(C, G)

    # Fold eval-mode BatchNorm + conv bias into the matmul weights/bias (glue-side,
    # O(C*G) one-time work on parameters).
    eps = 1e-5
    bn_scale = params["bn_gamma"] / jnp.sqrt(params["bn_var"] + eps)
    bn_shift = params["bn_beta"] - params["bn_mean"] * bn_scale
    w_eff = bn_scale[:, None] * w_bd                                 # (C, G)
    b_eff = (bn_scale * params["b_conv"] + bn_shift).reshape(C, 1)   # (C, 1)

    # LinearWithConstraint (max_norm=0.5): reshape to (nClass, C, S) (feature index
    # in torch.flatten order c*S + s) and tile over the batch block so the head
    # fuses into the same kernel.
    w_lin = renorm_rows(params["w_lin"], 0.5).reshape(nClass, C, S)
    w_head = jnp.tile(w_lin, (1, 1, Bb))                             # (nClass, C, Bb*S)
    b_lin = params["b_lin"].reshape(nClass, 1)

    # Static 0/1 selector matrices: segment sums and per-batch sums as matmuls.
    seg_sel = (jnp.arange(Bb * T)[:, None] // Ts
               == jnp.arange(Bb * S)[None, :]).astype(jnp.float32)   # (Bb*T, Bb*S)
    bat_sel = (jnp.arange(Bb * S)[:, None] // S
               == jnp.arange(Bb)[None, :]).astype(jnp.float32)       # (Bb*S, Bb)

    # glue: (B, nChan, T, nBands) -> (nb, G, Bb*T), g = band*nChan + chan.
    xp = jnp.transpose(x, (0, 3, 1, 2)).reshape(B, G, T)
    xq = xp.reshape(nb, Bb, G, T).transpose(0, 2, 1, 3).reshape(nb, G, Bb * T)

    cost = pl.CostEstimate(
        flops=int(2 * C * G * B * T + 4 * C * B * T * S * Bb + 6 * B * C * T),
        transcendentals=int(B * C * T + B * C * S + B * nClass),
        bytes_accessed=int(4 * (xq.size + w_eff.size + b_eff.size + seg_sel.size
                                + w_head.size + bat_sel.size + b_lin.size
                                + nb * nClass * Bb)),
    )

    out_t = pl.pallas_call(
        functools.partial(fbcnet_fused_kernel, Ts=Ts, nClass=nClass),
        out_shape=jax.ShapeDtypeStruct((nb, nClass, Bb), jnp.float32),
        grid=(nb,),
        in_specs=[
            pl.BlockSpec((1, G, Bb * T), lambda i: (i, 0, 0)),
            pl.BlockSpec((C, G), lambda i: (0, 0)),
            pl.BlockSpec((C, 1), lambda i: (0, 0)),
            pl.BlockSpec((Bb * T, Bb * S), lambda i: (0, 0)),
            pl.BlockSpec((nClass, C, Bb * S), lambda i: (0, 0, 0)),
            pl.BlockSpec((Bb * S, Bb), lambda i: (0, 0)),
            pl.BlockSpec((nClass, 1), lambda i: (0, 0)),
        ],
        out_specs=pl.BlockSpec((1, nClass, Bb), lambda i: (i, 0, 0)),
        compiler_params=pltpu.CompilerParams(dimension_semantics=("parallel",)),
        cost_estimate=cost,
    )(xq, w_eff, b_eff, seg_sel, w_head, bat_sel, b_lin)

    # (nb, nClass, Bb) -> (B, nClass)
    return out_t.transpose(0, 2, 1).reshape(B, nClass)


def fbcnet_reference(x, params, *, nChan, nBands, m, strideFactor, nClass):
    """Pure-JAX reference mirroring the PyTorch forward (eval-mode BN)."""
    B, _, T, _ = x.shape
    C = m * nBands
    S = strideFactor
    Ts = T // S
    w_conv = renorm_rows(params["w_conv"], 2.0).reshape(nBands, m, nChan)
    xp = jnp.transpose(x, (0, 3, 1, 2))                              # (B, nBands, nChan, T)
    y = jnp.einsum("bgct,gjc->bgjt", xp, w_conv).reshape(B, C, T)
    y = y + params["b_conv"][None, :, None]
    eps = 1e-5
    y = (y - params["bn_mean"][None, :, None]) / jnp.sqrt(params["bn_var"][None, :, None] + eps)
    y = y * params["bn_gamma"][None, :, None] + params["bn_beta"][None, :, None]
    y = y * jax.nn.sigmoid(y)
    y = y.reshape(B, C, S, Ts)
    var = jnp.var(y, axis=3, ddof=1)
    feat = jnp.log(jnp.clip(var, 1e-6, 1e6)).reshape(B, C * S)
    w_lin = renorm_rows(params["w_lin"], 0.5)
    logits = feat @ w_lin.T + params["b_lin"][None, :]
    return jax.nn.log_softmax(logits, axis=1)


if __name__ == "__main__":
    # small, shape-consistent config: nChan=4, T=32, nBands=4, m=8, strideFactor=4
    B, nChan, T, nBands = 2, 4, 32, 4
    m, strideFactor, nClass = 8, 4, 2
    C = m * nBands
    F = C * strideFactor

    key = jax.random.PRNGKey(0)
    ks = jax.random.split(key, 9)
    params = {
        "w_conv": 0.5 * jax.random.normal(ks[0], (C, 1, nChan, 1), jnp.float32),
        "b_conv": 0.1 * jax.random.normal(ks[1], (C,), jnp.float32),
        "bn_gamma": 1.0 + 0.1 * jax.random.normal(ks[2], (C,), jnp.float32),
        "bn_beta": 0.1 * jax.random.normal(ks[3], (C,), jnp.float32),
        "bn_mean": 0.1 * jax.random.normal(ks[4], (C,), jnp.float32),
        "bn_var": jax.random.uniform(ks[5], (C,), jnp.float32, 0.5, 1.5),
        "w_lin": 0.2 * jax.random.normal(ks[6], (nClass, F), jnp.float32),
        "b_lin": 0.05 * jax.random.normal(ks[7], (nClass,), jnp.float32),
    }
    x = jax.random.normal(ks[8], (B, nChan, T, nBands), jnp.float32)

    out = fbcnet_forward(x, params, nChan=nChan, nBands=nBands, m=m,
                         strideFactor=strideFactor, nClass=nClass)
    out = jax.block_until_ready(out)

    ref = fbcnet_reference(x, params, nChan=nChan, nBands=nBands, m=m,
                           strideFactor=strideFactor, nClass=nClass)
    assert out.shape == (B, nClass)
    assert jnp.allclose(out, ref, rtol=1e-2, atol=1e-2), (out, ref)
    print("KERNEL_OK")
</pallas_src>

<mosaic_0001>
module attributes {stable_mosaic.version = 11 : i64} {
  func.func @fbcnet_fused_kernel(%arg0: i32, %arg1: memref<1x16x64xf32, #tpu.memory_space<vmem>>, %arg2: memref<32x16xf32, #tpu.memory_space<vmem>>, %arg3: memref<32x1xf32, #tpu.memory_space<vmem>>, %arg4: memref<64x8xf32, #tpu.memory_space<vmem>>, %arg5: memref<2x32x8xf32, #tpu.memory_space<vmem>>, %arg6: memref<8x2xf32, #tpu.memory_space<vmem>>, %arg7: memref<2x1xf32, #tpu.memory_space<vmem>>, %arg8: memref<1x2x2xf32, #tpu.memory_space<vmem>>) attributes {dimension_semantics = [#tpu.dimension_semantics<parallel>], iteration_bounds = array<i64: 1>, scalar_prefetch = 0 : i64, scratch_operands = 0 : i64, tpu.core_type = #tpu.core_type<tc>, window_params = [{transform_indices = @transform_0, window_bounds = array<i64: 1, 16, 64>}, {pipeline_mode = #tpu.pipeline_mode<synchronous>, transform_indices = @transform_1, window_bounds = array<i64: 32, 16>}, {pipeline_mode = #tpu.pipeline_mode<synchronous>, transform_indices = @transform_2, window_bounds = array<i64: 32, 1>}, {pipeline_mode = #tpu.pipeline_mode<synchronous>, transform_indices = @transform_3, window_bounds = array<i64: 64, 8>}, {pipeline_mode = #tpu.pipeline_mode<synchronous>, transform_indices = @transform_4, window_bounds = array<i64: 2, 32, 8>}, {pipeline_mode = #tpu.pipeline_mode<synchronous>, transform_indices = @transform_5, window_bounds = array<i64: 8, 2>}, {pipeline_mode = #tpu.pipeline_mode<synchronous>, transform_indices = @transform_6, window_bounds = array<i64: 2, 1>}, {transform_indices = @transform_7, window_bounds = array<i64: 1, 2, 2>}]} {
    %c0 = arith.constant 0 : index
    %c0_0 = arith.constant 0 : index
    %c0_1 = arith.constant 0 : index
    %0 = vector.load %arg1[%c0, %c0_0, %c0_1] : memref<1x16x64xf32, #tpu.memory_space<vmem>>, vector<1x16x64xf32>
    %1 = vector.shape_cast %0 : vector<1x16x64xf32> to vector<16x64xf32>
    %c0_2 = arith.constant 0 : index
    %c0_3 = arith.constant 0 : index
    %2 = vector.load %arg2[%c0_2, %c0_3] : memref<32x16xf32, #tpu.memory_space<vmem>>, vector<32x16xf32>
    %cst = arith.constant dense<0.000000e+00> : vector<32x64xf32>
    %3 = tpu.matmul %2, %1, %cst {dimension_numbers = #tpu.dot_dimension_numbers<[1], [0], [0], [1], [0, 0, 1, 1], [], []>} : vector<32x16xf32>, vector<16x64xf32>, vector<32x64xf32> -> vector<32x64xf32>
    %c0_4 = arith.constant 0 : index
    %c0_5 = arith.constant 0 : index
    %4 = vector.load %arg3[%c0_4, %c0_5] : memref<32x1xf32, #tpu.memory_space<vmem>>, vector<32x1xf32>
    %5 = vector.broadcast %4 : vector<32x1xf32> to vector<32x64xf32>
    %6 = arith.addf %3, %5 : vector<32x64xf32>
    %7 = arith.negf %6 : vector<32x64xf32>
    %8 = math.exp %7 : vector<32x64xf32>
    %cst_6 = arith.constant 1.000000e+00 : f32
    %9 = vector.broadcast %cst_6 : f32 to vector<32x64xf32>
    %10 = arith.addf %9, %8 : vector<32x64xf32>
    %11 = arith.divf %9, %10 : vector<32x64xf32>
    %12 = arith.mulf %6, %11 : vector<32x64xf32>
    %c0_7 = arith.constant 0 : index
    %c0_8 = arith.constant 0 : index
    %13 = vector.load %arg4[%c0_7, %c0_8] : memref<64x8xf32, #tpu.memory_space<vmem>>, vector<64x8xf32>
    %cst_9 = arith.constant dense<0.000000e+00> : vector<32x8xf32>
    %14 = tpu.matmul %12, %13, %cst_9 {dimension_numbers = #tpu.dot_dimension_numbers<[1], [0], [0], [1], [0, 0, 1, 1], [], []>} : vector<32x64xf32>, vector<64x8xf32>, vector<32x8xf32> -> vector<32x8xf32>
    %15 = arith.mulf %12, %12 : vector<32x64xf32>
    %cst_10 = arith.constant dense<0.000000e+00> : vector<32x8xf32>
    %16 = tpu.matmul %15, %13, %cst_10 {dimension_numbers = #tpu.dot_dimension_numbers<[1], [0], [0], [1], [0, 0, 1, 1], [], []>} : vector<32x64xf32>, vector<64x8xf32>, vector<32x8xf32> -> vector<32x8xf32>
    %cst_11 = arith.constant 1.250000e-01 : f32
    %17 = vector.broadcast %cst_11 : f32 to vector<32x8xf32>
    %18 = arith.mulf %14, %17 : vector<32x8xf32>
    %19 = arith.mulf %18, %14 : vector<32x8xf32>
    %20 = arith.subf %16, %19 : vector<32x8xf32>
    %cst_12 = arith.constant 0.142857149 : f32
    %21 = vector.broadcast %cst_12 : f32 to vector<32x8xf32>
    %22 = arith.mulf %20, %21 : vector<32x8xf32>
    %cst_13 = arith.constant 9.99999997E-7 : f32
    %cst_14 = arith.constant 1.000000e+06 : f32
    %23 = vector.broadcast %cst_13 : f32 to vector<32x8xf32>
    %24 = arith.maximumf %23, %22 : vector<32x8xf32>
    %25 = vector.broadcast %cst_14 : f32 to vector<32x8xf32>
    %26 = arith.minimumf %25, %24 : vector<32x8xf32>
    %27 = math.log %26 : vector<32x8xf32>
    %c0_15 = arith.constant 0 : index
    %c0_16 = arith.constant 0 : index
    %c0_17 = arith.constant 0 : index
    %28 = vector.load %arg5[%c0_15, %c0_16, %c0_17] : memref<2x32x8xf32, #tpu.memory_space<vmem>>, vector<1x32x8xf32>
    %29 = vector.shape_cast %28 : vector<1x32x8xf32> to vector<32x8xf32>
    %30 = arith.mulf %27, %29 : vector<32x8xf32>
    %cst_18 = arith.constant dense<0.000000e+00> : vector<8xf32>
    %31 = vector.multi_reduction <add>, %30, %cst_18 [0] : vector<32x8xf32> to vector<8xf32>
    %32 = vector.shape_cast %31 : vector<8xf32> to vector<1x8xf32>
    %c1 = arith.constant 1 : index
    %c0_19 = arith.constant 0 : index
    %c0_20 = arith.constant 0 : index
    %33 = vector.load %arg5[%c1, %c0_19, %c0_20] : memref<2x32x8xf32, #tpu.memory_space<vmem>>, vector<1x32x8xf32>
    %34 = vector.shape_cast %33 : vector<1x32x8xf32> to vector<32x8xf32>
    %35 = arith.mulf %27, %34 : vector<32x8xf32>
    %cst_21 = arith.constant dense<0.000000e+00> : vector<8xf32>
    %36 = vector.multi_reduction <add>, %35, %cst_21 [0] : vector<32x8xf32> to vector<8xf32>
    %37 = vector.shape_cast %36 : vector<8xf32> to vector<1x8xf32>
    %38 = tpu.concatenate %32, %37 in 0 : vector<1x8xf32>, vector<1x8xf32> -> vector<2x8xf32>
    %c0_22 = arith.constant 0 : index
    %c0_23 = arith.constant 0 : index
    %39 = vector.load %arg6[%c0_22, %c0_23] : memref<8x2xf32, #tpu.memory_space<vmem>>, vector<8x2xf32>
    %cst_24 = arith.constant dense<0.000000e+00> : vector<2x2xf32>
    %40 = tpu.matmul %38, %39, %cst_24 {dimension_numbers = #tpu.dot_dimension_numbers<[1], [0], [0], [1], [0, 0, 1, 1], [], []>} : vector<2x8xf32>, vector<8x2xf32>, vector<2x2xf32> -> vector<2x2xf32>
    %c0_25 = arith.constant 0 : index
    %c0_26 = arith.constant 0 : index
    %41 = vector.load %arg7[%c0_25, %c0_26] : memref<2x1xf32, #tpu.memory_space<vmem>>, vector<2x1xf32>
    %42 = vector.broadcast %41 : vector<2x1xf32> to vector<2x2xf32>
    %43 = arith.addf %40, %42 : vector<2x2xf32>
    %cst_27 = arith.constant dense<0xFF800000> : vector<2xf32>
    %44 = vector.multi_reduction <maximumf>, %43, %cst_27 [0] : vector<2x2xf32> to vector<2xf32>
    %45 = vector.shape_cast %44 : vector<2xf32> to vector<1x2xf32>
    %46 = vector.broadcast %45 : vector<1x2xf32> to vector<2x2xf32>
    %47 = arith.subf %43, %46 : vector<2x2xf32>
    %48 = math.exp %47 : vector<2x2xf32>
    %cst_28 = arith.constant dense<0.000000e+00> : vector<2xf32>
    %49 = vector.multi_reduction <add>, %48, %cst_28 [0] : vector<2x2xf32> to vector<2xf32>
    %50 = vector.shape_cast %49 : vector<2xf32> to vector<1x2xf32>
    %51 = math.log %50 : vector<1x2xf32>
    %52 = arith.addf %51, %45 : vector<1x2xf32>
    %53 = vector.broadcast %52 : vector<1x2xf32> to vector<2x2xf32>
    %54 = arith.subf %43, %53 : vector<2x2xf32>
    %c0_29 = arith.constant 0 : index
    %c0_30 = arith.constant 0 : index
    %c0_31 = arith.constant 0 : index
    %55 = vector.load %arg8[%c0_29, %c0_30, %c0_31] : memref<1x2x2xf32, #tpu.memory_space<vmem>>, vector<1x2x2xf32>
    %56 = vector.shape_cast %55 : vector<1x2x2xf32> to vector<2x2xf32>
    %57 = vector.shape_cast %54 : vector<2x2xf32> to vector<1x2x2xf32>
    tpu.vector_store %arg8[%c0_29, %c0_30, %c0_31], %57 {strides = array<i32>} : memref<1x2x2xf32, #tpu.memory_space<vmem>>, vector<1x2x2xf32>,
    return
  }
  func.func @transform_0(%arg0: i32) -> (i32, i32, i32) {
    %c0_i32 = arith.constant 0 : i32
    %c0_i32_0 = arith.constant 0 : i32
    %c0_i32_1 = arith.constant 0 : i32
    return %arg0, %c0_i32, %c0_i32_0 : i32, i32, i32
  }
  func.func @transform_1(%arg0: i32) -> (i32, i32) {
    %c0_i32 = arith.constant 0 : i32
    %c0_i32_0 = arith.constant 0 : i32
    %c0_i32_1 = arith.constant 0 : i32
    return %c0_i32, %c0_i32_0 : i32, i32
  }
  func.func @transform_2(%arg0: i32) -> (i32, i32) {
    %c0_i32 = arith.constant 0 : i32
    %c0_i32_0 = arith.constant 0 : i32
    %c0_i32_1 = arith.constant 0 : i32
    return %c0_i32, %c0_i32_0 : i32, i32
  }
  func.func @transform_3(%arg0: i32) -> (i32, i32) {
    %c0_i32 = arith.constant 0 : i32
    %c0_i32_0 = arith.constant 0 : i32
    %c0_i32_1 = arith.constant 0 : i32
    return %c0_i32, %c0_i32_0 : i32, i32
  }
  func.func @transform_4(%arg0: i32) -> (i32, i32, i32) {
    %c0_i32 = arith.constant 0 : i32
    %c0_i32_0 = arith.constant 0 : i32
    %c0_i32_1 = arith.constant 0 : i32
    %c0_i32_2 = arith.constant 0 : i32
    return %c0_i32, %c0_i32_0, %c0_i32_1 : i32, i32, i32
  }
  func.func @transform_5(%arg0: i32) -> (i32, i32) {
    %c0_i32 = arith.constant 0 : i32
    %c0_i32_0 = arith.constant 0 : i32
    %c0_i32_1 = arith.constant 0 : i32
    return %c0_i32, %c0_i32_0 : i32, i32
  }
  func.func @transform_6(%arg0: i32) -> (i32, i32) {
    %c0_i32 = arith.constant 0 : i32
    %c0_i32_0 = arith.constant 0 : i32
    %c0_i32_1 = arith.constant 0 : i32
    return %c0_i32, %c0_i32_0 : i32, i32
  }
  func.func @transform_7(%arg0: i32) -> (i32, i32, i32) {
    %c0_i32 = arith.constant 0 : i32
    %c0_i32_0 = arith.constant 0 : i32
    %c0_i32_1 = arith.constant 0 : i32
    return %arg0, %c0_i32, %c0_i32_0 : i32, i32, i32
  }
}

</mosaic_0001>

<bundles_post_ra>
// kernel: tpu_custom_call.1
= control target key start
LH: loop header
LB: loop body
LE: loop exit
PB: predicated region body
PF: predicated region fallthrough
CT: control target
= control target key end

     0   :  { %vm57_vm0 = vcmask 130048   ;;  %v791_v4 = vmov 0   ;;  %s955_s0 = inlined_call_operand.vmem [shape: f32[1,16,64], index: 0, kind: input, shape index: {}]   ;;  %s956_s1 = inlined_call_operand.vmem [shape: f32[32,16], index: 1, kind: input, shape index: {}]   ;;  %s957_s2 = inlined_call_operand.vmem [shape: f32[32,1], index: 2, kind: input, shape index: {}]   ;;  %s958_s3 = inlined_call_operand.vmem [shape: f32[64,8], index: 3, kind: input, shape index: {}]   ;;  %s959_s4 = inlined_call_operand.vmem [shape: f32[2,32,8], index: 4, kind: input, shape index: {}]   ;;  %s960_s5 = inlined_call_operand.vmem [shape: f32[8,2], index: 5, kind: input, shape index: {}]   ;;  %s961_s6 = inlined_call_operand.vmem [shape: f32[2,1], index: 6, kind: input, shape index: {}]   ;;  %s962_s7 = inlined_call_operand.hbm [shape: f32[1,2,2], index: 7, kind: output, shape index: {}]  }
   0x1   :  { %v27_v0 = vld [vmem:[%s955_s0] sm:$0xff]  ;;  %v28_v1 = vld [vmem:[%s955_s0 + $0x8] sm:$0xff]  ;;  %737 = vset.pattern.permute.xlu0 %v791_v4  ;;  %738 = vset.pattern.permute.xlu1 %v791_v4  ;;  %v35_v6 = vld [vmem:[%s957_s2 + $0x10] sm:$0xff] }
   0x2   :  { %v29_v2 = vld [vmem:[%s956_s1] sm:$0xff]  ;;  %v697_v3 = vpack.c.bf16 %v28_v1, %v27_v0 }
   0x3   :  { %642 = vmatprep.mubr.msk.f32.mxu0 %vm57_vm0, %v29_v2  ;;  %v33_v5 = vld [vmem:[%s957_s2] sm:$0xff] }
   0x4   :  { %698 = vmatprep.subr.bf16.mxu0 %v697_v3  ;;  %39 = vperm.xlu0 %737, %v33_v5  }
   0x5   :  { %12 = vsyncpa [#allocation3], 0  ;;  %700 = vmatpush3.bf16.msra.mxu0 %v697_v3  ;;  %v30_v7 = vld [vmem:[%s956_s1 + $0x8] sm:$0xff]  ;;  %49 = vperm.xlu1 %738, %v35_v6   ;;  %v31_v9 = vld [vmem:[%s956_s1 + $0x10] sm:$0xff]  ;;  %vm191_vm1 = vcmask 523264   ;;  %v792_v62 = vmov 0.0  }
   0x6   :  { %v34_v8 = vld [vmem:[%s957_s2 + $0x8] sm:$0xff]  ;;  %v36_v10 = vld [vmem:[%s957_s2 + $0x18] sm:$0xff]  ;;  %v469_v12 = vld [vmem:[%s961_s6] sm:$0x3]  ;;  %vm793_vm2 = vmmov 0   ;;  %vm430_vm3 = vcmask 64512  }
   0x7   :  { %v32_v11 = vld [vmem:[%s956_s1 + $0x18] sm:$0xff]  ;;  %v183_v13 = vld [vmem:[%s958_s3] sm:$0xff]  ;;  %v184_v14 = vld [vmem:[%s958_s3 + $0x8] sm:$0xff]  ;;  %vm466_vm4 = vcmask 1040384   ;;  %vm548_vm5 = vcmask 9216  }
   0x8   :  { %643 = vmatmul.mubr.msk.f32.vlgmr.msra.gmra.mrb[0].mxu0 %vm57_vm0, %v30_v7  ;;  %44 = vperm.xlu0 %737, %v34_v8   ;;  %v701_v15 = vpack.c.bf16 %v184_v14, %v183_v13  ;;  %v185_v16 = vld [vmem:[%s958_s3 + $0x10] sm:$0xff]  ;;  %v186_v17 = vld [vmem:[%s958_s3 + $0x18] sm:$0xff]  ;;  %v187_v19 = vld [vmem:[%s958_s3 + $0x20] sm:$0xff] }
   0x9   :  { %645 = vmatprep.mubr.msk.f32.mxu0 %vm57_vm0, %v31_v9  ;;  %54 = vperm.xlu1 %738, %v36_v10   ;;  %v705_v18 = vpack.c.bf16 %v186_v17, %v185_v16  ;;  %v188_v20 = vld [vmem:[%s958_s3 + $0x28] sm:$0xff]  ;;  %v189_v22 = vld [vmem:[%s958_s3 + $0x30] sm:$0xff]  ;;  %v190_v23 = vld [vmem:[%s958_s3 + $0x38] sm:$0xff] }
   0xa   :  { %702 = vmatprep.subr.bf16.mxu1 %v701_v15  ;;  %718 = vmatprep.subr.bf16.mxu0 %v701_v15  ;;  %v709_v21 = vpack.c.bf16 %v188_v20, %v187_v19  ;;  %v713_v24 = vpack.c.bf16 %v190_v23, %v189_v22  ;;  %v468_v61 = vld [vmem:[%s960_s5] sm:$0xff] }
   0xb   :  { %704 = vmatpush3.bf16.msra.mxu1 %v701_v15  ;;  %720 = vmatpush3.bf16.msra.mxu0 %v701_v15 }
   0xc   :  { %646 = vmatmul.mubr.msk.f32.gmra.mrb[2].mxu0 %vm57_vm0, %v32_v11  ;;  %472 = vperm.xlu0 %737, %v469_v12  }
   0xd   :  { %706 = vmatprep.subr.bf16.mxu1 %v705_v18  ;;  %722 = vmatprep.subr.bf16.mxu0 %v705_v18 }
   0xf   :  { %708 = vmatpush3.bf16.msra.mxu1 %v705_v18  ;;  %724 = vmatpush3.bf16.msra.mxu0 %v705_v18 }
  0x10   :  { %710 = vmatprep.subr.bf16.mxu1 %v709_v21  ;;  %726 = vmatprep.subr.bf16.mxu0 %v709_v21 }
  0x13   :  { %712 = vmatpush3.bf16.msra.mxu1 %v709_v21  ;;  %728 = vmatpush3.bf16.msra.mxu0 %v709_v21 }
  0x14   :  { %714 = vmatprep.subr.bf16.mxu1 %v713_v24  ;;  %730 = vmatprep.subr.bf16.mxu0 %v713_v24 }
  0x17   :  { %716 = vmatpush3.bf16.msra.mxu1 %v713_v24  ;;  %732 = vmatpush3.bf16.msra.mxu0 %v713_v24 }
  0x18   :  { %692 = vmatprep.subr.mxu1 %v792_v62 }
  0x83   :  { %v40_v25 = vpop.permute.xlu0 %39 }
  0x84   :  { %v50_v26 = vpop.permute.xlu1 %49 }
  0x87   :  { %v45_v27 = vpop.permute.xlu0 %44 }
  0x88   :  { %v55_v34 = vpop.permute.xlu1 %54 }
  0xdb   :  { %v644_v28 = vpop.f32.mrb[0].mxu0 }
  0xdc   :  { %v142_v29 = vadd.f32 %v644_v28, %v45_v27  ;;  %v136_v30 = vpop.f32.mrb[1].mxu0 }
  0xdd   :  { %v137_v31 = vadd.f32 %v136_v30, %v40_v25 }
  0xde   :  { %v590_v32 = vmul.f32 -1.442695, %v142_v29 }
  0xdf   :  { %v589_v33 = vmul.f32 -1.442695, %v137_v31  ;;  %v647_v35 = vpop.f32.mrb[2].mxu0 }
  0xe0   :  { %739 = vpow2.f32 %v590_v32  ;;  %v152_v36 = vadd.f32 %v647_v35, %v55_v34  ;;  %v146_v37 = vpop.f32.mrb[3].mxu0  ;;  %v423_v32 = vld [vmem:[%s959_s4 + $0x8] sm:$0xff] }
  0xe1   :  { %741 = vpow2.f32 %v589_v33  ;;  %v147_v38 = vadd.f32 %v146_v37, %v50_v26  ;;  %v602_v33 = vld [vmem:[%s959_s4 + $0x28] sm:$0xff]  ;;  %v601_v37 = vld [vmem:[%s959_s4 + $0x20] sm:$0xff] }
  0xe2   :  { %v592_v39 = vmul.f32 -1.442695, %v152_v36 }
  0xe3   :  { %v591_v40 = vmul.f32 -1.442695, %v147_v38 }
  0xe4   :  { %743 = vpow2.f32 %v592_v39 }
  0xe5   :  { %745 = vpow2.f32 %v591_v40 }
  0xea   :  { %v740_v41 = vpop.eup %739 }
  0xeb   :  { %v742_v42 = vpop.eup %741  ;;  %v168_v43 = vadd.f32 1.0, %v740_v41 }
  0xec   :  { %v167_v44 = vadd.f32 1.0, %v742_v42 }
  0xed   :  { %747 = vrcp.f32 %v168_v43 }
  0xee   :  { %v744_v45 = vpop.eup %743  ;;  %749 = vrcp.f32 %v167_v44  ;;  %v425_v44 = vld [vmem:[%s959_s4 + $0x18] sm:$0xff] }
  0xef   :  { %v746_v46 = vpop.eup %745  ;;  %v170_v47 = vadd.f32 1.0, %v744_v45  ;;  %v604_v45 = vld [vmem:[%s959_s4 + $0x38] sm:$0xff] }
  0xf0   :  { %v169_v48 = vadd.f32 1.0, %v746_v46 }
  0xf1   :  { %751 = vrcp.f32 %v170_v47 }
  0xf2   :  { %753 = vrcp.f32 %v169_v48 }
  0xf7   :  { %v748_v49 = vpop.eup %747 }
  0xf8   :  { %v750_v50 = vpop.eup %749  ;;  %v180_v51 = vmul.f32 %v748_v49, %v142_v29 }
  0xf9   :  { %v179_v52 = vmul.f32 %v750_v50, %v137_v31  ;;  %v424_v50 = vld [vmem:[%s959_s4 + $0x10] sm:$0xff] }
  0xfa   :  { %v290_v56 = vmul.f32 %v180_v51, %v180_v51 }
  0xfb   :  { %v752_v53 = vpop.eup %751  ;;  %664 = vmatprep.mubr.msk.f32.mxu1 %vm191_vm1, %v179_v52  ;;  %v289_v54 = vmul.f32 %v179_v52, %v179_v52 }
  0xfc   :  { %v754_v55 = vpop.eup %753  ;;  %v182_v57 = vmul.f32 %v752_v53, %v152_v36  ;;  %665 = vmatmul.mubr.msk.f32.vlgmr.msra.gmra.mrb[0].mxu1 %vm191_vm1, %v180_v51  ;;  %v422_v36 = vld [vmem:[%s959_s4] sm:$0xff]  ;;  %v603_v51 = vld [vmem:[%s959_s4 + $0x30] sm:$0xff]  ;;  %s794_s4 = smov [#allocation2]  }
  0xfd   :  { %v181_v58 = vmul.f32 %v754_v55, %v147_v38  ;;  %686 = vmatprep.mubr.msk.f32.mxu0 %vm191_vm1, %v289_v54  ;;  %693 = vmatpush3.msra.mxu1 %v468_v61  ;;  %s577_s25 = sshll.u32 %s794_s4, 4  ;;  %s578_s25 = int_to_ptr.vmem [resolvable:$true] %s577_s25 }
  0xfe   :  { %687 = vmatmul.mubr.msk.f32.vlgmr.msra.gmra.mrb[4].mxu0 %vm191_vm1, %v290_v56  ;;  %v292_v60 = vmul.f32 %v182_v57, %v182_v57  ;;  %s767_s6 = scalar_lea.vmem %s578_s25, 32  ;;  %p772_p1 = scmp.lt.s32.totalorder %s578_s25, %s578_s25 }
  0xff   :  { %v291_v59 = vmul.f32 %v181_v58, %v181_v58  ;;  %667 = vmatprep.mubr.msk.f32.mxu1 %vm191_vm1, %v181_v58  ;;  %p768_p0 = scmp.ne.s32.totalorder %s578_s25, %s767_s6  ;;  %p773_p2 = scmp.lt.s32.totalorder %s767_s6, %s767_s6 }
 0x100   :  { %668 = vmatmul.mubr.msk.f32.gmra.mrb[2].mxu1 %vm191_vm1, %v182_v57 }
 0x101   :  { %689 = vmatprep.mubr.msk.f32.mxu0 %vm191_vm1, %v291_v59  ;;  %694 = vmatprep.mubr.msk.f32.mxu1 %vm793_vm2, %v792_v62  ;;  %p774_p3 = por %p773_p2, %p772_p1 }
 0x102   :  { %690 = vmatmul.mubr.msk.f32.gmra.mrb[6].mxu0 %vm191_vm1, %v292_v60 }
 0x103   :  { %p775_p4 = pnand %p774_p3, %p768_p0 }
 0x1cf   :  { %v666_v63 = vpop.f32.mrb[0].mxu1 }
 0x1d0   :  { %v391_v0 = vmul.f32 0.125, %v666_v63  ;;  %v270_v1 = vpop.f32.mrb[1].mxu1 }
 0x1d1   :  { %v390_v2 = vmul.f32 0.125, %v270_v1  ;;  %v688_v3 = vpop.f32.mrb[4].mxu0 }
 0x1d2   :  { %v395_v4 = vmul.f32 %v666_v63, %v391_v0  ;;  %v371_v5 = vpop.f32.mrb[5].mxu0 }
 0x1d3   :  { %v394_v6 = vmul.f32 %v390_v2, %v270_v1  ;;  %v669_v7 = vpop.f32.mrb[2].mxu1 }
 0x1d4   :  { %v399_v8 = vsub.f32 %v688_v3, %v395_v4  ;;  %v393_v9 = vmul.f32 0.125, %v669_v7  ;;  %v280_v10 = vpop.f32.mrb[3].mxu1 }
 0x1d5   :  { %v398_v11 = vsub.f32 %v371_v5, %v394_v6  ;;  %v392_v12 = vmul.f32 0.125, %v280_v10  ;;  %v691_v13 = vpop.f32.mrb[6].mxu0 }
 0x1d6   :  { %v403_v14 = vmul.f32 0.14285715, %v399_v8  ;;  %v397_v15 = vmul.f32 %v669_v7, %v393_v9  ;;  %v381_v16 = vpop.f32.mrb[7].mxu0 }
 0x1d7   :  { %v402_v17 = vmul.f32 0.14285715, %v398_v11  ;;  %v396_v18 = vmul.f32 %v392_v12, %v280_v10 }
 0x1d8   :  { %v407_v19 = vmax.f32 %v403_v14, 1e-06  ;;  %v401_v20 = vsub.f32 %v691_v13, %v397_v15 }
 0x1d9   :  { %v406_v21 = vmax.f32 %v402_v17, 1e-06  ;;  %v400_v22 = vsub.f32 %v381_v16, %v396_v18  ;;  %v473_v18 = vpop.permute.xlu0 %472 }
 0x1da   :  { %v411_v23 = vmin.f32 %v407_v19, 1000000.0  ;;  %v405_v24 = vmul.f32 0.14285715, %v401_v20 }
 0x1db   :  { %v410_v25 = vmin.f32 %v406_v21, 1000000.0  ;;  %v404_v26 = vmul.f32 0.14285715, %v400_v22 }
 0x1dc   :  { %755 = vlog2.f32 %v411_v23  ;;  %v409_v27 = vmax.f32 %v405_v24, 1e-06 }
 0x1dd   :  { %757 = vlog2.f32 %v410_v25  ;;  %v408_v28 = vmax.f32 %v404_v26, 1e-06 }
 0x1de   :  { %v413_v29 = vmin.f32 %v409_v27, 1000000.0 }
 0x1df   :  { %v412_v30 = vmin.f32 %v408_v28, 1000000.0 }
 0x1e0   :  { %759 = vlog2.f32 %v413_v29 }
 0x1e1   :  { %761 = vlog2.f32 %v412_v30 }
 0x1e6   :  { %v756_v31 = vpop.eup %755 }
 0x1e7   :  { %v758_v34 = vpop.eup %757  ;;  %v417_v35 = vmul.f32 0.6931472, %v756_v31 }
 0x1e8   :  { %v415_v38 = vmul.f32 0.6931472, %v758_v34 }
 0x1e9   :  { %v427_v39 = vmul.f32 %v423_v32, %v417_v35  ;;  %v450_v40 = vmul.f32 %v602_v33, %v417_v35 }
 0x1ea   :  { %v760_v41 = vpop.eup %759  ;;  %v426_v42 = vmul.f32 %v422_v36, %v415_v38  ;;  %v449_v43 = vmul.f32 %v601_v37, %v415_v38 }
 0x1eb   :  { %v762_v46 = vpop.eup %761  ;;  %v432_v47 = vsel %vm430_vm3, %v427_v39, 0.0  ;;  %v454_v48 = vsel %vm430_vm3, %v450_v40, 0.0  ;;  %v421_v49 = vmul.f32 0.6931472, %v760_v41 }
 0x1ec   :  { %v431_v52 = vsel %vm430_vm3, %v426_v42, 0.0  ;;  %v453_v53 = vsel %vm430_vm3, %v449_v43, 0.0  ;;  %v419_v54 = vmul.f32 0.6931472, %v762_v46 }
 0x1ed   :  { %v433_v55 = vadd.f32 %v432_v47, %v431_v52  ;;  %v455_v56 = vadd.f32 %v454_v48, %v453_v53  ;;  %v429_v57 = vmul.f32 %v425_v44, %v421_v49  ;;  %v452_v58 = vmul.f32 %v604_v45, %v421_v49 }
 0x1ee   :  { %v428_v59 = vmul.f32 %v424_v50, %v419_v54  ;;  %v451_v60 = vmul.f32 %v603_v51, %v419_v54 }
 0x1ef   :  { %v436_v1 = vsel %vm430_vm3, %v429_v57, 0.0  ;;  %v458_v2 = vsel %vm430_vm3, %v452_v58, 0.0 }
 0x1f0   :  { %v434_v61 = vsel %vm430_vm3, %v428_v59, 0.0  ;;  %v456_v62 = vsel %vm430_vm3, %v451_v60, 0.0 }
 0x1f1   :  { %v435_v63 = vadd.f32 %v434_v61, %v433_v55  ;;  %v457_v0 = vadd.f32 %v456_v62, %v455_v56 }
 0x1f3   :  { %v437_v3 = vadd.f32 %v436_v1, %v435_v63  ;;  %v459_v4 = vadd.f32 %v458_v2, %v457_v0 }
 0x1f5   :  { %v438_v5 = vrot.slane %v437_v3, 4  ;;  %v460_v6 = vrot.slane %v459_v4, 4 }
 0x1f7   :  { %v439_v7 = vadd.f32 %v438_v5, %v437_v3  ;;  %v461_v8 = vadd.f32 %v460_v6, %v459_v4 }
 0x1f9   :  { %v440_v9 = vrot.slane %v439_v7, 2  ;;  %v462_v10 = vrot.slane %v461_v8, 2 }
 0x1fb   :  { %v441_v11 = vadd.f32 %v440_v9, %v439_v7  ;;  %v463_v12 = vadd.f32 %v462_v10, %v461_v8 }
 0x1fd   :  { %v442_v13 = vrot.slane %v441_v11, 1  ;;  %v464_v14 = vrot.slane %v463_v12, 1 }
 0x1ff   :  { %v443_v15 = vadd.f32 %v442_v13, %v441_v11  ;;  %v465_v16 = vadd.f32 %v464_v14, %v463_v12 }
 0x201   :  { %v467_v17 = vsel %vm466_vm4, %v443_v15, %v465_v16 }
 0x202   :  { %695 = vmatmul.mubr.msk.f32.vlgmr.msra.gmra.mrb[4].mxu1 %vm430_vm3, %v467_v17 }
 0x2d5   :  { %v544_v19 = vpop.f32.mrb[4].mxu1 }
 0x2d6   :  { %v545_v20 = vadd.f32 %v544_v19, %v473_v18  ;;  %v696_v21 = vpop.f32.mrb[5].mxu1 }
 0x2d8   :  { %v549_v22 = vsel %vm548_vm5, %v545_v20, -inf }
 0x2d9   :  { %v550_v23 = vrot.slane %v549_v22, 4 }
 0x2db   :  { %v551_v24 = vmax.f32 %v549_v22, %v550_v23 }
 0x2dd   :  { %v552_v25 = vrot.slane %v551_v24, 2 }
 0x2df   :  { %v553_v26 = vmax.f32 %v551_v24, %v552_v25 }
 0x2e1   :  { %v554_v27 = vrot.slane %v553_v26, 1 }
 0x2e3   :  { %v555_v28 = vmax.f32 %v553_v26, %v554_v27 }
 0x2e5   :  { %v556_v29 = vsub.f32 %v545_v20, %v555_v28 }
 0x2e7   :  { %v557_v30 = vmul.f32 1.442695, %v556_v29 }
 0x2e9   :  { %763 = vpow2.f32 %v557_v30 }
 0x2f3   :  { %v764_v31 = vpop.eup %763 }
 0x2f4   :  { %v559_v32 = vsel %vm548_vm5, %v764_v31, 0.0 }
 0x2f5   :  { %v560_v33 = vrot.slane %v559_v32, 4 }
 0x2f7   :  { %v561_v34 = vadd.f32 %v560_v33, %v559_v32 }
 0x2f9   :  { %v562_v35 = vrot.slane %v561_v34, 2 }
 0x2fb   :  { %v563_v36 = vadd.f32 %v562_v35, %v561_v34 }
 0x2fd   :  { %v564_v37 = vrot.slane %v563_v36, 1 }
 0x2ff   :  { %v565_v38 = vadd.f32 %v564_v37, %v563_v36 }
 0x301   :  { %765 = vlog2.f32 %v565_v38 }
 0x30b   :  { %v766_v39 = vpop.eup %765 }
 0x30c   :  { %v567_v40 = vmul.f32 0.6931472, %v766_v39 }
 0x30e   :  { %v568_v41 = vadd.f32 %v567_v40, %v555_v28 }
 0x310   :  { %v569_v42 = vsub.f32 %v545_v20, %v568_v41 }
 0x312   :  { %570 = vst.msk [vmem:[#allocation2] sm:$0x3] %vm548_vm5, %v569_v42 }
 0x313   :  { %778 = shalt.err (!%p775_p4)
}
 0x314   :  { %s779_s28 = scalar_lea.hbm %s962_s7, 32 }
 0x315   :  { %p780_p5 = scmp.ne.s32.totalorder %s962_s7, %s779_s28  ;;  %p783_p6 = scmp.lt.u32.totalorder %s779_s28, %s962_s7 }
 0x317   :  { %p785_p7 = pnand %p783_p6, %p780_p5 }
 0x319   :  { %788 = shalt.err (!%p785_p7)
}
 0x31a   :  { %580 = dma.vmem_to_hbm [thread:$0]  %s578_s25, 32, %s962_s7, [#allocation3]  }
 0x31b   :  { %789 = dma.done.wait [#allocation3], 32  }
 0x31c   :  { %790 = vsyncadd [#allocation3], 4294967264 }
 0x31d   :  { %584 = vsyncpa [#allocation3], 1 }

</bundles_post_ra>
